<compile_context>
chip_gen: v5e
topology: v5e:2x2
jax: 0.10.0
libtpu: 0.0.40
codegen_flags: <defaults>
</compile_context>

<pallas_src>
import jax
import jax.numpy as jnp
from jax import lax
from jax.experimental import pallas as pl
from jax.experimental.pallas import tpu as pltpu


def _round_up(x: int, m: int) -> int:
    return ((x + m - 1) // m) * m


def _linear_relu_kernel(x_ref, w_ref, b_ref, o_ref):
    # x_ref: (TB, K), w_ref: (N, K) untransposed, b_ref: (1, N), o_ref: (TB, N)
    acc = lax.dot_general(
        x_ref[...], w_ref[...],
        dimension_numbers=(((1,), (1,)), ((), ())),   # contract K with K -> (TB, N)
        preferred_element_type=jnp.float32,
    )
    acc = acc + b_ref[...]                            # (1, N) broadcasts over batch rows
    o_ref[...] = jnp.maximum(acc, 0.0).astype(o_ref.dtype)


def function_approximation_forward(x, weight, bias, *, tb_max: int = 512):
    """x: (B, n_in) f32, weight: (n_out, n_in) f32, bias: (n_out,) f32."""
    B, n_in = x.shape
    n_out = weight.shape[0]

    # Lane/sublane-aligned padded problem: K, N -> multiples of 128, batch -> multiple of TB.
    K = _round_up(n_in, 128)
    N = _round_up(n_out, 128)
    TB = min(_round_up(B, 8), tb_max)     # batch tile: multiple of 8, capped for VMEM headroom
    Bp = _round_up(B, TB)

    # Zero-padding: extra K columns contribute 0 to the dot; extra N columns are
    # sliced away below.  (In a real deployment the padded weight/bias would be
    # materialized once at parameter-creation time, not per call.)
    xp = jnp.pad(x, ((0, Bp - B), (0, K - n_in)))
    wp = jnp.pad(weight, ((0, N - n_out), (0, K - n_in)))
    bp = jnp.pad(bias, (0, N - n_out)).reshape(1, N)

    grid = (Bp // TB,)
    cost = pl.CostEstimate(
        flops=2 * Bp * K * N,
        transcendentals=0,
        bytes_accessed=4 * (Bp * K + N * K + N + Bp * N),
    )

    out = pl.pallas_call(
        _linear_relu_kernel,
        out_shape=jax.ShapeDtypeStruct((Bp, N), x.dtype),
        grid_spec=pltpu.PrefetchScalarGridSpec(
            num_scalar_prefetch=0,
            grid=grid,
            in_specs=[
                pl.BlockSpec((TB, K), lambda i: (i, 0)),   # x: tiled over batch
                pl.BlockSpec((N, K), lambda i: (0, 0)),    # weight: VMEM-resident
                pl.BlockSpec((1, N), lambda i: (0, 0)),    # bias:   VMEM-resident
            ],
            out_specs=pl.BlockSpec((TB, N), lambda i: (i, 0)),
        ),
        compiler_params=pltpu.CompilerParams(
            # Batch tiles are independent -> let megacore / 2-TC sharding apply.
            dimension_semantics=("parallel",),
        ),
        cost_estimate=cost,
    )(xp, wp, bp)

    return out[:B, :n_out]


if __name__ == "__main__":
    # Shapes implied by the module: linear map n_inputs -> n_outputs on a batch.
    batch, n_inputs, n_hiddens, n_outputs = 8, 32, 32, 16  # n_hiddens unused (1-layer net)

    key = jax.random.PRNGKey(0)
    kx, kw, kb = jax.random.split(key, 3)

    # Deterministic parameter init, matching nn.Linear's U(-1/sqrt(fan_in), 1/sqrt(fan_in)).
    bound = 1.0 / jnp.sqrt(jnp.float32(n_inputs))
    weight = jax.random.uniform(kw, (n_outputs, n_inputs), jnp.float32, -bound, bound)
    bias = jax.random.uniform(kb, (n_outputs,), jnp.float32, -bound, bound)

    x = jax.random.normal(kx, (batch, n_inputs), jnp.float32)

    fwd = jax.jit(function_approximation_forward)
    y = fwd(x, weight, bias)
    jax.block_until_ready(y)

    # Reference check against plain JAX (same math as torch F.relu(fc1(x))).
    y_ref = jnp.maximum(x @ weight.T + bias, 0.0)
    assert y.shape == (batch, n_outputs)
    assert jnp.allclose(y, y_ref, atol=1e-5, rtol=1e-5)

    print("KERNEL_OK")
</pallas_src>

<mosaic_0001>
module attributes {stable_mosaic.version = 11 : i64} {
  func.func @_linear_relu_kernel(%arg0: i32, %arg1: memref<8x128xf32, #tpu.memory_space<vmem>>, %arg2: memref<128x128xf32, #tpu.memory_space<vmem>>, %arg3: memref<1x128xf32, #tpu.memory_space<vmem>>, %arg4: memref<8x128xf32, #tpu.memory_space<vmem>>) attributes {dimension_semantics = [#tpu.dimension_semantics<parallel>], iteration_bounds = array<i64: 1>, scalar_prefetch = 0 : i64, scratch_operands = 0 : i64, tpu.core_type = #tpu.core_type<tc>, window_params = [{transform_indices = @transform_0, window_bounds = array<i64: 8, 128>}, {pipeline_mode = #tpu.pipeline_mode<synchronous>, transform_indices = @transform_1, window_bounds = array<i64: 128, 128>}, {pipeline_mode = #tpu.pipeline_mode<synchronous>, transform_indices = @transform_2, window_bounds = array<i64: 1, 128>}, {transform_indices = @transform_3, window_bounds = array<i64: 8, 128>}]} {
    %c0 = arith.constant 0 : index
    %c0_0 = arith.constant 0 : index
    %0 = vector.load %arg1[%c0, %c0_0] : memref<8x128xf32, #tpu.memory_space<vmem>>, vector<8x128xf32>
    %c0_1 = arith.constant 0 : index
    %c0_2 = arith.constant 0 : index
    %1 = vector.load %arg2[%c0_1, %c0_2] : memref<128x128xf32, #tpu.memory_space<vmem>>, vector<128x128xf32>
    %cst = arith.constant dense<0.000000e+00> : vector<8x128xf32>
    %2 = tpu.matmul %0, %1, %cst {dimension_numbers = #tpu.dot_dimension_numbers<[1], [1], [0], [0], [0, 0, 1, 0], [], []>} : vector<8x128xf32>, vector<128x128xf32>, vector<8x128xf32> -> vector<8x128xf32>
    %c0_3 = arith.constant 0 : index
    %c0_4 = arith.constant 0 : index
    %3 = vector.load %arg3[%c0_3, %c0_4] : memref<1x128xf32, #tpu.memory_space<vmem>>, vector<1x128xf32>
    %4 = vector.broadcast %3 : vector<1x128xf32> to vector<8x128xf32>
    %5 = arith.addf %2, %4 : vector<8x128xf32>
    %cst_5 = arith.constant 0.000000e+00 : f32
    %6 = vector.broadcast %cst_5 : f32 to vector<8x128xf32>
    %7 = arith.maximumf %5, %6 : vector<8x128xf32>
    %c0_6 = arith.constant 0 : index
    %c0_7 = arith.constant 0 : index
    %8 = vector.load %arg4[%c0_6, %c0_7] : memref<8x128xf32, #tpu.memory_space<vmem>>, vector<8x128xf32>
    tpu.vector_store %arg4[%c0_6, %c0_7], %7 {strides = array<i32>} : memref<8x128xf32, #tpu.memory_space<vmem>>, vector<8x128xf32>,
    return
  }
  func.func @transform_0(%arg0: i32) -> (i32, i32) {
    %c0_i32 = arith.constant 0 : i32
    %c0_i32_0 = arith.constant 0 : i32
    return %arg0, %c0_i32 : i32, i32
  }
  func.func @transform_1(%arg0: i32) -> (i32, i32) {
    %c0_i32 = arith.constant 0 : i32
    %c0_i32_0 = arith.constant 0 : i32
    %c0_i32_1 = arith.constant 0 : i32
    return %c0_i32, %c0_i32_0 : i32, i32
  }
  func.func @transform_2(%arg0: i32) -> (i32, i32) {
    %c0_i32 = arith.constant 0 : i32
    %c0_i32_0 = arith.constant 0 : i32
    %c0_i32_1 = arith.constant 0 : i32
    return %c0_i32, %c0_i32_0 : i32, i32
  }
  func.func @transform_3(%arg0: i32) -> (i32, i32) {
    %c0_i32 = arith.constant 0 : i32
    %c0_i32_0 = arith.constant 0 : i32
    return %arg0, %c0_i32 : i32, i32
  }
}

</mosaic_0001>

<bundles_post_ra>
// kernel: function_approximation_forward.1
= control target key start
LH: loop header
LB: loop body
LE: loop exit
PB: predicated region body
PF: predicated region fallthrough
CT: control target
= control target key end

     0   :  { %s180_s0 = inlined_call_operand.vmem [shape: f32[8,128], index: 0, kind: input, shape index: {}]   ;;  %s181_s1 = inlined_call_operand.vmem [shape: f32[128,128], index: 1, kind: input, shape index: {}]   ;;  %s182_s2 = inlined_call_operand.vmem [shape: f32[1,128], index: 2, kind: input, shape index: {}]   ;;  %s183_s3 = inlined_call_operand.hbm [shape: f32[8,128], index: 3, kind: output, shape index: {}]  }
   0x1   :  { %v31_v0 = vld [vmem:[%s181_s1 + $0x78] sm:$0xff]  ;;  %v30_v1 = vld [vmem:[%s181_s1 + $0x70] sm:$0xff] }
   0x2   :  { %36 = vmatpush.xpose.msra.mxu0 %v31_v0 }
   0x3   :  { %8 = vsyncpa [#allocation3], 0  ;;  %v29_v2 = vld [vmem:[%s181_s1 + $0x68] sm:$0xff]  ;;  %v28_v3 = vld [vmem:[%s181_s1 + $0x60] sm:$0xff]  ;;  %s102_s21 = smov [#allocation2]   ;;  %s65_s25 = sshll.u32 %s183_s3, 4  ;;  %s66_s25 = int_to_ptr.hbm [resolvable:$true] %s65_s25 }
   0x4   :  { %v27_v4 = vld [vmem:[%s181_s1 + $0x58] sm:$0xff]  ;;  %v26_v5 = vld [vmem:[%s181_s1 + $0x50] sm:$0xff]  ;;  %v25_v6 = vld [vmem:[%s181_s1 + $0x48] sm:$0xff]  ;;  %s63_s22 = sshll.u32 %s102_s21, 4  ;;  %s64_s22 = int_to_ptr.vmem [resolvable:$true] %s63_s22 }
   0x5   :  { %v24_v7 = vld [vmem:[%s181_s1 + $0x40] sm:$0xff]  ;;  %v23_v8 = vld [vmem:[%s181_s1 + $0x38] sm:$0xff]  ;;  %v22_v9 = vld [vmem:[%s181_s1 + $0x30] sm:$0xff] }
   0x6   :  { %37 = vmatpush.xpose.msra.mxu0 %v30_v1  ;;  %v21_v10 = vld [vmem:[%s181_s1 + $0x28] sm:$0xff]  ;;  %v20_v11 = vld [vmem:[%s181_s1 + $0x20] sm:$0xff]  ;;  %v19_v12 = vld [vmem:[%s181_s1 + $0x18] sm:$0xff] }
   0x7   :  { %v18_v13 = vld [vmem:[%s181_s1 + $0x10] sm:$0xff]  ;;  %v17_v14 = vld [vmem:[%s181_s1 + $0x8] sm:$0xff]  ;;  %v16_v15 = vld [vmem:[%s181_s1] sm:$0xff] }
   0x8   :  { %v15_v16 = vld [vmem:[%s180_s0] sm:$0xff] }
   0x9   :  { %v75_v17 = vld [vmem:[%s182_s2] ss:$0 sm:$0xff] }
   0xa   :  { %38 = vmatpush.xpose.msra.mxu0 %v29_v2 }
   0xe   :  { %39 = vmatpush.xpose.msra.mxu0 %v28_v3 }
  0x12   :  { %40 = vmatpush.xpose.msra.mxu0 %v27_v4 }
  0x16   :  { %41 = vmatpush.xpose.msra.mxu0 %v26_v5 }
  0x1a   :  { %42 = vmatpush.xpose.msra.mxu0 %v25_v6 }
  0x1e   :  { %43 = vmatpush.xpose.msra.mxu0 %v24_v7 }
  0x22   :  { %44 = vmatpush.xpose.msra.mxu0 %v23_v8 }
  0x26   :  { %45 = vmatpush.xpose.msra.mxu0 %v22_v9 }
  0x2a   :  { %46 = vmatpush.xpose.msra.mxu0 %v21_v10 }
  0x2e   :  { %47 = vmatpush.xpose.msra.mxu0 %v20_v11 }
  0x32   :  { %48 = vmatpush.xpose.msra.mxu0 %v19_v12 }
  0x36   :  { %49 = vmatpush.xpose.msra.mxu0 %v18_v13 }
  0x3a   :  { %50 = vmatpush.xpose.msra.mxu0 %v17_v14 }
  0x3e   :  { %51 = vmatpush.xpose.msra.mxu0 %v16_v15 }
  0x41   :  { %52 = vmatmul.f32.vlgmr.msra.gmra.mxu0 %v15_v16 }
  0xbe   :  { %v53_v18 = vpop.f32.mrf.mxu0 }
  0xbf   :  { %v54_v19 = vadd.f32 %v75_v17, %v53_v18 }
  0xc1   :  { %v56_v20 = vmax.f32 %v54_v19, 0.0 }
  0xc3   :  { %57 = vst [vmem:[#allocation2] sm:$0xff] %v56_v20 }
  0xc4   :  { %68 = dma.vmem_to_hbm [thread:$0]  %s64_s22, 128, %s66_s25, [#allocation3]  }
  0xc5   :  { %100 = dma.done.wait [#allocation3], 128  }
  0xc6   :  { %101 = vsyncadd [#allocation3], 4294967168 }
  0xc7   :  { %73 = vsyncpa [#allocation3], 1 }

</bundles_post_ra>
